<compile_context>
chip_gen: v6e
topology: v6e:2x2x1
jax: 0.10.0
libtpu: 0.0.40
codegen_flags: <defaults>
</compile_context>

<pallas_src>
import functools

import jax
import jax.numpy as jnp
from jax.experimental import pallas as pl
from jax.experimental.pallas import tpu as pltpu


# ------------------------------- helpers ------------------------------------

def _round_up(x, m):
    return (x + m - 1) // m * m


def _pad2(a, rows, cols):
    r, c = a.shape
    if r == rows and c == cols:
        return a
    return jnp.pad(a, ((0, rows - r), (0, cols - c)))


def _vmem_limit(est_bytes):
    # leave headroom; cap at 64 MiB so the same setting is valid on v7x.
    # TODO(synk): per-generation tile/vmem sweep (v5e 16 MiB default, v7x 64 MiB phys).
    return int(min(max(2 * est_bytes, 16 * 2**20), 64 * 2**20))


# ----------------------------- Pallas kernels -------------------------------

def fused_vision_kernel(x_ref, w1_ref, b1_ref, w2_ref, b2_ref, o_ref, acc_ref):
    """out = ((x @ w1 + b1) @ w2 + b2), K-reduction tiled, f32 accumulate."""
    k = pl.program_id(1)

    @pl.when(k == 0)
    def _():
        acc_ref[...] = jnp.zeros_like(acc_ref)

    acc_ref[...] += jnp.dot(x_ref[...], w1_ref[...],
                            preferred_element_type=jnp.float32)

    @pl.when(k == pl.num_programs(1) - 1)
    def _():
        t = (acc_ref[...] + b1_ref[...]).astype(jnp.bfloat16)
        out = jnp.dot(t, w2_ref[...], preferred_element_type=jnp.float32)
        o_ref[...] = (out + b2_ref[...]).astype(o_ref.dtype)


def masked_matmul_bias_kernel(x_ref, m_ref, w_ref, b_ref, o_ref, acc_ref):
    """out = (x * row_mask) @ w + b, K-reduction tiled, f32 accumulate."""
    k = pl.program_id(1)

    @pl.when(k == 0)
    def _():
        acc_ref[...] = jnp.zeros_like(acc_ref)

    x = x_ref[...] * m_ref[...]          # mask rides a free VPU slot under the MXU
    acc_ref[...] += jnp.dot(x, w_ref[...], preferred_element_type=jnp.float32)

    @pl.when(k == pl.num_programs(1) - 1)
    def _():
        o_ref[...] = (acc_ref[...] + b_ref[...]).astype(o_ref.dtype)


# ------------------------- pallas_call wrappers ------------------------------

def fused_vision_matmul(x, w1, b1, w2, b2, *, out_dtype=jnp.bfloat16):
    """((x @ w1 + b1) @ w2 + b2) with one fused, tiled pallas_call."""
    M, K = x.shape
    N = w1.shape[1]

    tm = min(256, _round_up(M, 8))
    tk = min(512, _round_up(K, 128))
    Np = _round_up(N, 128)               # lane-dense output (multiple of 128)
    Mp = _round_up(M, tm)
    Kp = _round_up(K, tk)

    xb = _pad2(x.astype(jnp.bfloat16), Mp, Kp)
    w1b = _pad2(w1.astype(jnp.bfloat16), Kp, Np)
    w2b = _pad2(w2.astype(jnp.bfloat16), Np, Np)
    b1p = _pad2(b1.reshape(1, -1).astype(jnp.float32), 1, Np)
    b2p = _pad2(b2.reshape(1, -1).astype(jnp.float32), 1, Np)

    grid = (Mp // tm, Kp // tk)
    flops = 2 * Mp * Np * Kp + 2 * Mp * Np * Np
    bytes_accessed = 2 * (Mp * Kp + Kp * Np + Np * Np + Mp * Np) + 8 * Np
    vmem_est = (2 * (tm * tk + tk * Np + tm * Np) * 2   # double-buffered bf16 tiles
                + Np * Np * 2 + tm * Np * 4 + 4 * Np * 4)

    out = pl.pallas_call(
        fused_vision_kernel,
        out_shape=jax.ShapeDtypeStruct((Mp, Np), out_dtype),
        grid_spec=pltpu.PrefetchScalarGridSpec(
            num_scalar_prefetch=0,
            grid=grid,
            in_specs=[
                pl.BlockSpec((tm, tk), lambda i, k: (i, k)),
                pl.BlockSpec((tk, Np), lambda i, k: (k, 0)),
                pl.BlockSpec((1, Np), lambda i, k: (0, 0)),
                pl.BlockSpec((Np, Np), lambda i, k: (0, 0)),
                pl.BlockSpec((1, Np), lambda i, k: (0, 0)),
            ],
            out_specs=pl.BlockSpec((tm, Np), lambda i, k: (i, 0)),
            scratch_shapes=[pltpu.VMEM((tm, Np), jnp.float32)],
        ),
        compiler_params=pltpu.CompilerParams(
            dimension_semantics=("parallel", "arbitrary"),
            vmem_limit_bytes=_vmem_limit(vmem_est),
        ),
        cost_estimate=pl.CostEstimate(
            flops=flops, transcendentals=0, bytes_accessed=bytes_accessed),
    )(xb, w1b, b1p, w2b, b2p)
    return out[:M, :N]


def masked_matmul_bias(x, row_mask, w, b, *, out_dtype=jnp.bfloat16):
    """(x * row_mask) @ w + b with the mask folded into the tiled kernel."""
    M, K = x.shape
    N = w.shape[1]

    tm = min(256, _round_up(M, 8))
    tk = min(512, _round_up(K, 128))
    Np = _round_up(N, 128)
    Mp = _round_up(M, tm)
    Kp = _round_up(K, tk)

    xb = _pad2(x.astype(jnp.bfloat16), Mp, Kp)
    mb = _pad2(row_mask.reshape(-1, 1).astype(jnp.bfloat16), Mp, 1)
    wb = _pad2(w.astype(jnp.bfloat16), Kp, Np)
    bp = _pad2(b.reshape(1, -1).astype(jnp.float32), 1, Np)

    grid = (Mp // tm, Kp // tk)
    flops = 2 * Mp * Np * Kp
    bytes_accessed = 2 * (Mp * Kp + Kp * Np + Mp * Np) + 2 * Mp + 4 * Np
    vmem_est = (2 * (tm * tk + tk * Np + tm * Np) * 2
                + tm * Np * 4 + 2 * tm + 4 * Np)

    out = pl.pallas_call(
        masked_matmul_bias_kernel,
        out_shape=jax.ShapeDtypeStruct((Mp, Np), out_dtype),
        grid_spec=pltpu.PrefetchScalarGridSpec(
            num_scalar_prefetch=0,
            grid=grid,
            in_specs=[
                pl.BlockSpec((tm, tk), lambda i, k: (i, k)),
                pl.BlockSpec((tm, 1), lambda i, k: (i, 0)),
                pl.BlockSpec((tk, Np), lambda i, k: (k, 0)),
                pl.BlockSpec((1, Np), lambda i, k: (0, 0)),
            ],
            out_specs=pl.BlockSpec((tm, Np), lambda i, k: (i, 0)),
            scratch_shapes=[pltpu.VMEM((tm, Np), jnp.float32)],
        ),
        compiler_params=pltpu.CompilerParams(
            dimension_semantics=("parallel", "arbitrary"),
            vmem_limit_bytes=_vmem_limit(vmem_est),
        ),
        cost_estimate=pl.CostEstimate(
            flops=flops, transcendentals=0, bytes_accessed=bytes_accessed),
    )(xb, mb, wb, bp)
    return out[:M, :N]


def l2_normalize(x, eps=1e-12):
    # F.normalize(x, dim=-1): tiny [B, D] rows — plain jnp, fused by XLA under jit.
    x = x.astype(jnp.float32)
    n = jnp.sqrt(jnp.sum(x * x, axis=-1, keepdims=True))
    return x / jnp.maximum(n, eps)


# --------------------------- parameter creation ------------------------------

def make_params(key, *, channels, patch, embed_dim, vocab_size, num_tasks,
                num_embeds):
    ks = jax.random.split(key, 8)
    scale = 0.02
    params = {
        # vision: Conv2d(channels, embed_dim, kernel=patch, stride=patch) — bf16 weights
        "patch_w": (scale * jax.random.normal(
            ks[0], (embed_dim, channels, patch, patch), jnp.float32)
                    ).astype(jnp.bfloat16),
        "patch_b": scale * jax.random.normal(ks[1], (embed_dim,), jnp.float32),
        # vision: per-token linear "encoder" — bf16 weights
        "venc_w": (scale * jax.random.normal(
            ks[2], (embed_dim, embed_dim), jnp.float32)).astype(jnp.bfloat16),
        "venc_b": scale * jax.random.normal(ks[3], (embed_dim,), jnp.float32),
        # text: token embedding + per-token linear
        "tok_emb": scale * jax.random.normal(
            ks[4], (vocab_size, embed_dim), jnp.float32),
        "tenc_w": (scale * jax.random.normal(
            ks[5], (embed_dim, embed_dim), jnp.float32)).astype(jnp.bfloat16),
        "tenc_b": scale * jax.random.normal(ks[6], (embed_dim,), jnp.float32),
        # wrapper: nn.ModuleList of nn.Embedding(num_tasks, embed_dim)
        "task_emb": scale * jax.random.normal(
            ks[7], (num_embeds, num_tasks, embed_dim), jnp.float32),
    }
    return params


# ------------------------------ forward pass ---------------------------------

def siglip_wrapper_forward(params, pixel_values, input_ids, attention_mask,
                           task_ids, *, patch, method="third"):
    B, C, H, W = pixel_values.shape
    D = params["patch_b"].shape[0]
    hp, wp_ = H // patch, W // patch
    P = hp * wp_
    Kc = C * patch * patch

    # ---- vision tower (synthetic stand-in) ----
    # TODO(synk): full SigLIP vision transformer (attention/MLP stack) replaced by
    # patch-embed conv + one per-token linear; wrapper-level semantics are exact.
    # im2col: [B, C, H, W] -> [B*P, C*ps*ps], feature order (C, ph, pw); K is the
    # contiguous last axis and gets zero-padded to a 128 multiple inside the wrapper.
    xp = pixel_values.reshape(B, C, hp, patch, wp_, patch)
    xp = jnp.transpose(xp, (0, 2, 4, 1, 3, 5)).reshape(B * P, Kc)
    w1 = params["patch_w"].reshape(D, Kc).T                     # [C*ps*ps, D]
    tokens = fused_vision_matmul(xp, w1, params["patch_b"],
                                 params["venc_w"], params["venc_b"])  # [B*P, D] bf16
    patch_tokens = tokens.reshape(B, P, D).astype(jnp.float32)  # last_hidden_state

    # ---- wrapper: task embeddings + method concat + pool + normalize ----
    task_embeds = jnp.stack(
        [jnp.take(params["task_emb"][i], task_ids, axis=0)
         for i in range(params["task_emb"].shape[0])], axis=1)  # [B, num_embeds, D]
    if method == "first":
        x = jnp.concatenate((task_embeds, patch_tokens), axis=1)
    elif method == "second":
        x = jnp.concatenate(
            [patch_tokens[:, :1, :], task_embeds, patch_tokens[:, 1:, :]], axis=1)
    elif method == "third":
        x = jnp.concatenate((patch_tokens, task_embeds), axis=1)
    else:
        x = patch_tokens
    pooled_img = x[:, 0, :]                                     # [B, D]
    image_features = l2_normalize(pooled_img)

    # ---- text tower (synthetic stand-in) ----
    # TODO(synk): full SigLIP text transformer replaced by token-embedding gather
    # (left in JAX) + attention-mask gating fused into the matmul kernel.
    S = input_ids.shape[1]
    tok = jnp.take(params["tok_emb"], input_ids.reshape(-1), axis=0)  # [B*S, D]
    tok_out = masked_matmul_bias(tok, attention_mask.reshape(B * S),
                                 params["tenc_w"], params["tenc_b"])  # [B*S, D] bf16
    text_last_hidden = tok_out.reshape(B, S, D)
    pooled_txt = text_last_hidden[:, 0, :]                            # [B, D]
    text_features = l2_normalize(pooled_txt)

    return image_features, text_features


# ---------------------------------- main -------------------------------------

if __name__ == "__main__":
    B = 2
    C = 3
    H = W = 16
    PATCH = 8
    D = 32          # embed_dim
    SEQ = 8
    VOCAB = 64
    NUM_TASKS = 5
    NUM_EMBEDS = 2

    root = jax.random.PRNGKey(0)
    kp, kx, ki, kt = jax.random.split(root, 4)

    params = make_params(kp, channels=C, patch=PATCH, embed_dim=D,
                         vocab_size=VOCAB, num_tasks=NUM_TASKS,
                         num_embeds=NUM_EMBEDS)

    pixel_values = jax.random.normal(kx, (B, C, H, W), jnp.float32)
    input_ids = jax.random.randint(ki, (B, SEQ), 0, VOCAB, jnp.int32)
    attention_mask = jnp.ones((B, SEQ), jnp.int32)
    task_ids = jax.random.randint(kt, (B,), 0, NUM_TASKS, jnp.int32)

    fwd = jax.jit(siglip_wrapper_forward, static_argnames=("patch", "method"))
    img_feat, txt_feat = fwd(params, pixel_values, input_ids, attention_mask,
                             task_ids, patch=PATCH, method="third")
    jax.block_until_ready((img_feat, txt_feat))

    assert img_feat.shape == (B, D) and txt_feat.shape == (B, D)
    # both outputs are unit-norm rows
    assert jnp.allclose(jnp.linalg.norm(img_feat, axis=-1), 1.0, atol=1e-5)
    assert jnp.allclose(jnp.linalg.norm(txt_feat, axis=-1), 1.0, atol=1e-5)
    print("KERNEL_OK")
</pallas_src>

<mosaic_0001>
module attributes {stable_mosaic.version = 11 : i64} {
  func.func @fused_vision_kernel(%arg0: i32, %arg1: i32, %arg2: memref<8x256xbf16, #tpu.memory_space<vmem>>, %arg3: memref<256x128xbf16, #tpu.memory_space<vmem>>, %arg4: memref<1x128xf32, #tpu.memory_space<vmem>>, %arg5: memref<128x128xbf16, #tpu.memory_space<vmem>>, %arg6: memref<1x128xf32, #tpu.memory_space<vmem>>, %arg7: memref<8x128xbf16, #tpu.memory_space<vmem>>, %arg8: memref<8x128xf32, #tpu.memory_space<vmem>>) attributes {dimension_semantics = [#tpu.dimension_semantics<parallel>, #tpu.dimension_semantics<arbitrary>], iteration_bounds = array<i64: 1, 1>, scalar_prefetch = 0 : i64, scratch_operands = 1 : i64, tpu.core_type = #tpu.core_type<tc>, window_params = [{transform_indices = @transform_0, window_bounds = array<i64: 8, 256>}, {transform_indices = @transform_1, window_bounds = array<i64: 256, 128>}, {pipeline_mode = #tpu.pipeline_mode<synchronous>, transform_indices = @transform_2, window_bounds = array<i64: 1, 128>}, {pipeline_mode = #tpu.pipeline_mode<synchronous>, transform_indices = @transform_3, window_bounds = array<i64: 128, 128>}, {pipeline_mode = #tpu.pipeline_mode<synchronous>, transform_indices = @transform_4, window_bounds = array<i64: 1, 128>}, {transform_indices = @transform_5, window_bounds = array<i64: 8, 128>}]} {
    %c0_i32 = arith.constant 0 : i32
    %0 = arith.cmpi eq, %arg1, %c0_i32 : i32
    %1 = arith.extui %0 : i1 to i32
    %c0_i32_0 = arith.constant 0 : i32
    %2 = arith.cmpi ne, %1, %c0_i32_0 : i32
    scf.if %2 {
      %cst_10 = arith.constant 0.000000e+00 : f32
      %12 = vector.broadcast %cst_10 : f32 to vector<8x128xf32>
      %c0_11 = arith.constant 0 : index
      %c0_12 = arith.constant 0 : index
      %13 = vector.load %arg8[%c0_11, %c0_12] : memref<8x128xf32, #tpu.memory_space<vmem>>, vector<8x128xf32>
      tpu.vector_store %arg8[%c0_11, %c0_12], %12 {strides = array<i32>} : memref<8x128xf32, #tpu.memory_space<vmem>>, vector<8x128xf32>,
    } else {
    }
    %c0 = arith.constant 0 : index
    %c0_1 = arith.constant 0 : index
    %3 = vector.load %arg8[%c0, %c0_1] : memref<8x128xf32, #tpu.memory_space<vmem>>, vector<8x128xf32>
    %c0_2 = arith.constant 0 : index
    %c0_3 = arith.constant 0 : index
    %4 = vector.load %arg2[%c0_2, %c0_3] : memref<8x256xbf16, #tpu.memory_space<vmem>>, vector<8x256xbf16>
    %c0_4 = arith.constant 0 : index
    %c0_5 = arith.constant 0 : index
    %5 = vector.load %arg3[%c0_4, %c0_5] : memref<256x128xbf16, #tpu.memory_space<vmem>>, vector<256x128xbf16>
    %cst = arith.constant dense<0.000000e+00> : vector<8x128xf32>
    %6 = tpu.matmul %4, %5, %cst {dimension_numbers = #tpu.dot_dimension_numbers<[1], [0], [0], [1], [0, 0, 1, 1], [], []>} : vector<8x256xbf16>, vector<256x128xbf16>, vector<8x128xf32> -> vector<8x128xf32>
    %7 = arith.addf %3, %6 : vector<8x128xf32>
    %c0_6 = arith.constant 0 : index
    %c0_7 = arith.constant 0 : index
    %8 = vector.load %arg8[%c0_6, %c0_7] : memref<8x128xf32, #tpu.memory_space<vmem>>, vector<8x128xf32>
    tpu.vector_store %arg8[%c0_6, %c0_7], %7 {strides = array<i32>} : memref<8x128xf32, #tpu.memory_space<vmem>>, vector<8x128xf32>,
    %c0_i32_8 = arith.constant 0 : i32
    %9 = arith.cmpi eq, %arg1, %c0_i32_8 : i32
    %10 = arith.extui %9 : i1 to i32
    %c0_i32_9 = arith.constant 0 : i32
    %11 = arith.cmpi ne, %10, %c0_i32_9 : i32
    scf.if %11 {
      %c0_10 = arith.constant 0 : index
      %c0_11 = arith.constant 0 : index
      %12 = vector.load %arg8[%c0_10, %c0_11] : memref<8x128xf32, #tpu.memory_space<vmem>>, vector<8x128xf32>
      %c0_12 = arith.constant 0 : index
      %c0_13 = arith.constant 0 : index
      %13 = vector.load %arg4[%c0_12, %c0_13] : memref<1x128xf32, #tpu.memory_space<vmem>>, vector<1x128xf32>
      %14 = vector.broadcast %13 : vector<1x128xf32> to vector<8x128xf32>
      %15 = arith.addf %12, %14 : vector<8x128xf32>
      %16 = arith.truncf %15 : vector<8x128xf32> to vector<8x128xbf16>
      %c0_14 = arith.constant 0 : index
      %c0_15 = arith.constant 0 : index
      %17 = vector.load %arg5[%c0_14, %c0_15] : memref<128x128xbf16, #tpu.memory_space<vmem>>, vector<128x128xbf16>
      %cst_16 = arith.constant dense<0.000000e+00> : vector<8x128xf32>
      %18 = tpu.matmul %16, %17, %cst_16 {dimension_numbers = #tpu.dot_dimension_numbers<[1], [0], [0], [1], [0, 0, 1, 1], [], []>} : vector<8x128xbf16>, vector<128x128xbf16>, vector<8x128xf32> -> vector<8x128xf32>
      %c0_17 = arith.constant 0 : index
      %c0_18 = arith.constant 0 : index
      %19 = vector.load %arg6[%c0_17, %c0_18] : memref<1x128xf32, #tpu.memory_space<vmem>>, vector<1x128xf32>
      %20 = vector.broadcast %19 : vector<1x128xf32> to vector<8x128xf32>
      %21 = arith.addf %18, %20 : vector<8x128xf32>
      %22 = arith.truncf %21 : vector<8x128xf32> to vector<8x128xbf16>
      %c0_19 = arith.constant 0 : index
      %c0_20 = arith.constant 0 : index
      %23 = vector.load %arg7[%c0_19, %c0_20] : memref<8x128xbf16, #tpu.memory_space<vmem>>, vector<8x128xbf16>
      tpu.vector_store %arg7[%c0_19, %c0_20], %22 {strides = array<i32>} : memref<8x128xbf16, #tpu.memory_space<vmem>>, vector<8x128xbf16>,
    } else {
    }
    return
  }
  func.func @transform_0(%arg0: i32, %arg1: i32) -> (i32, i32) {
    %c0_i32 = arith.constant 0 : i32
    return %arg0, %arg1 : i32, i32
  }
  func.func @transform_1(%arg0: i32, %arg1: i32) -> (i32, i32) {
    %c0_i32 = arith.constant 0 : i32
    %c0_i32_0 = arith.constant 0 : i32
    return %arg1, %c0_i32 : i32, i32
  }
  func.func @transform_2(%arg0: i32, %arg1: i32) -> (i32, i32) {
    %c0_i32 = arith.constant 0 : i32
    %c0_i32_0 = arith.constant 0 : i32
    %c0_i32_1 = arith.constant 0 : i32
    return %c0_i32, %c0_i32_0 : i32, i32
  }
  func.func @transform_3(%arg0: i32, %arg1: i32) -> (i32, i32) {
    %c0_i32 = arith.constant 0 : i32
    %c0_i32_0 = arith.constant 0 : i32
    %c0_i32_1 = arith.constant 0 : i32
    return %c0_i32, %c0_i32_0 : i32, i32
  }
  func.func @transform_4(%arg0: i32, %arg1: i32) -> (i32, i32) {
    %c0_i32 = arith.constant 0 : i32
    %c0_i32_0 = arith.constant 0 : i32
    %c0_i32_1 = arith.constant 0 : i32
    return %c0_i32, %c0_i32_0 : i32, i32
  }
  func.func @transform_5(%arg0: i32, %arg1: i32) -> (i32, i32) {
    %c0_i32 = arith.constant 0 : i32
    %c0_i32_0 = arith.constant 0 : i32
    return %arg0, %c0_i32 : i32, i32
  }
}

module attributes {stable_mosaic.version = 11 : i64} {
  func.func @masked_matmul_bias_kernel(%arg0: i32, %arg1: i32, %arg2: memref<16x128xbf16, #tpu.memory_space<vmem>>, %arg3: memref<16x1xbf16, #tpu.memory_space<vmem>>, %arg4: memref<128x128xbf16, #tpu.memory_space<vmem>>, %arg5: memref<1x128xf32, #tpu.memory_space<vmem>>, %arg6: memref<16x128xbf16, #tpu.memory_space<vmem>>, %arg7: memref<16x128xf32, #tpu.memory_space<vmem>>) attributes {dimension_semantics = [#tpu.dimension_semantics<parallel>, #tpu.dimension_semantics<arbitrary>], iteration_bounds = array<i64: 1, 1>, scalar_prefetch = 0 : i64, scratch_operands = 1 : i64, tpu.core_type = #tpu.core_type<tc>, window_params = [{transform_indices = @transform_0, window_bounds = array<i64: 16, 128>}, {transform_indices = @transform_1, window_bounds = array<i64: 16, 1>}, {transform_indices = @transform_2, window_bounds = array<i64: 128, 128>}, {pipeline_mode = #tpu.pipeline_mode<synchronous>, transform_indices = @transform_3, window_bounds = array<i64: 1, 128>}, {transform_indices = @transform_4, window_bounds = array<i64: 16, 128>}]} {
    %c0_i32 = arith.constant 0 : i32
    %0 = arith.cmpi eq, %arg1, %c0_i32 : i32
    %1 = arith.extui %0 : i1 to i32
    %c0_i32_0 = arith.constant 0 : i32
    %2 = arith.cmpi ne, %1, %c0_i32_0 : i32
    scf.if %2 {
      %cst_12 = arith.constant 0.000000e+00 : f32
      %15 = vector.broadcast %cst_12 : f32 to vector<16x128xf32>
      %c0_13 = arith.constant 0 : index
      %c0_14 = arith.constant 0 : index
      %16 = vector.load %arg7[%c0_13, %c0_14] : memref<16x128xf32, #tpu.memory_space<vmem>>, vector<16x128xf32>
      tpu.vector_store %arg7[%c0_13, %c0_14], %15 {strides = array<i32>} : memref<16x128xf32, #tpu.memory_space<vmem>>, vector<16x128xf32>,
    } else {
    }
    %c0 = arith.constant 0 : index
    %c0_1 = arith.constant 0 : index
    %3 = vector.load %arg2[%c0, %c0_1] : memref<16x128xbf16, #tpu.memory_space<vmem>>, vector<16x128xbf16>
    %c0_2 = arith.constant 0 : index
    %c0_3 = arith.constant 0 : index
    %4 = vector.load %arg3[%c0_2, %c0_3] : memref<16x1xbf16, #tpu.memory_space<vmem>>, vector<16x1xbf16>
    %5 = vector.broadcast %4 : vector<16x1xbf16> to vector<16x128xbf16>
    %6 = arith.mulf %3, %5 : vector<16x128xbf16>
    %c0_4 = arith.constant 0 : index
    %c0_5 = arith.constant 0 : index
    %7 = vector.load %arg7[%c0_4, %c0_5] : memref<16x128xf32, #tpu.memory_space<vmem>>, vector<16x128xf32>
    %c0_6 = arith.constant 0 : index
    %c0_7 = arith.constant 0 : index
    %8 = vector.load %arg4[%c0_6, %c0_7] : memref<128x128xbf16, #tpu.memory_space<vmem>>, vector<128x128xbf16>
    %cst = arith.constant dense<0.000000e+00> : vector<16x128xf32>
    %9 = tpu.matmul %6, %8, %cst {dimension_numbers = #tpu.dot_dimension_numbers<[1], [0], [0], [1], [0, 0, 1, 1], [], []>} : vector<16x128xbf16>, vector<128x128xbf16>, vector<16x128xf32> -> vector<16x128xf32>
    %10 = arith.addf %7, %9 : vector<16x128xf32>
    %c0_8 = arith.constant 0 : index
    %c0_9 = arith.constant 0 : index
    %11 = vector.load %arg7[%c0_8, %c0_9] : memref<16x128xf32, #tpu.memory_space<vmem>>, vector<16x128xf32>
    tpu.vector_store %arg7[%c0_8, %c0_9], %10 {strides = array<i32>} : memref<16x128xf32, #tpu.memory_space<vmem>>, vector<16x128xf32>,
    %c0_i32_10 = arith.constant 0 : i32
    %12 = arith.cmpi eq, %arg1, %c0_i32_10 : i32
    %13 = arith.extui %12 : i1 to i32
    %c0_i32_11 = arith.constant 0 : i32
    %14 = arith.cmpi ne, %13, %c0_i32_11 : i32
    scf.if %14 {
      %c0_12 = arith.constant 0 : index
      %c0_13 = arith.constant 0 : index
      %15 = vector.load %arg7[%c0_12, %c0_13] : memref<16x128xf32, #tpu.memory_space<vmem>>, vector<16x128xf32>
      %c0_14 = arith.constant 0 : index
      %c0_15 = arith.constant 0 : index
      %16 = vector.load %arg5[%c0_14, %c0_15] : memref<1x128xf32, #tpu.memory_space<vmem>>, vector<1x128xf32>
      %17 = vector.broadcast %16 : vector<1x128xf32> to vector<16x128xf32>
      %18 = arith.addf %15, %17 : vector<16x128xf32>
      %19 = arith.truncf %18 : vector<16x128xf32> to vector<16x128xbf16>
      %c0_16 = arith.constant 0 : index
      %c0_17 = arith.constant 0 : index
      %20 = vector.load %arg6[%c0_16, %c0_17] : memref<16x128xbf16, #tpu.memory_space<vmem>>, vector<16x128xbf16>
      tpu.vector_store %arg6[%c0_16, %c0_17], %19 {strides = array<i32>} : memref<16x128xbf16, #tpu.memory_space<vmem>>, vector<16x128xbf16>,
    } else {
    }
    return
  }
  func.func @transform_0(%arg0: i32, %arg1: i32) -> (i32, i32) {
    %c0_i32 = arith.constant 0 : i32
    return %arg0, %arg1 : i32, i32
  }
  func.func @transform_1(%arg0: i32, %arg1: i32) -> (i32, i32) {
    %c0_i32 = arith.constant 0 : i32
    %c0_i32_0 = arith.constant 0 : i32
    return %arg0, %c0_i32 : i32, i32
  }
  func.func @transform_2(%arg0: i32, %arg1: i32) -> (i32, i32) {
    %c0_i32 = arith.constant 0 : i32
    %c0_i32_0 = arith.constant 0 : i32
    return %arg1, %c0_i32 : i32, i32
  }
  func.func @transform_3(%arg0: i32, %arg1: i32) -> (i32, i32) {
    %c0_i32 = arith.constant 0 : i32
    %c0_i32_0 = arith.constant 0 : i32
    %c0_i32_1 = arith.constant 0 : i32
    return %c0_i32, %c0_i32_0 : i32, i32
  }
  func.func @transform_4(%arg0: i32, %arg1: i32) -> (i32, i32) {
    %c0_i32 = arith.constant 0 : i32
    %c0_i32_0 = arith.constant 0 : i32
    return %arg0, %c0_i32 : i32, i32
  }
}

</mosaic_0001>

<bundles_post_ra>
// kernel: siglip_wrapper_forward.2
= control target key start
LH: loop header
LB: loop body
LE: loop exit
PB: predicated region body
PF: predicated region fallthrough
CT: control target
= control target key end

     0   :  { %v442_v1 = vmov 0.0   ;;  %vm443_vm0 = vmmov 0   ;;  %s567_s1 = inlined_call_operand.vmem [shape: bf16[256,128], index: 1, kind: input, shape index: {}]   ;;  %s568_s0 = inlined_call_operand.vmem [shape: bf16[8,256], index: 0, kind: input, shape index: {}]   ;;  %s569_s3 = inlined_call_operand.vmem [shape: bf16[128,128], index: 3, kind: input, shape index: {}]   ;;  %s570_s2 = inlined_call_operand.vmem [shape: f32[1,128], index: 2, kind: input, shape index: {}]   ;;  %s571_s4 = inlined_call_operand.vmem [shape: f32[1,128], index: 4, kind: input, shape index: {}]   ;;  %s572_s5 = inlined_call_operand.vmem [shape: bf16[8,128], index: 5, kind: output, shape index: {}]  }
   0x1   :  { %v416_v0 = vld [vmem:[%s567_s1 + $0x78] sm:$0xff]   ;;  %394 = vmatprep.subr.bf16.mxu1 %v442_v1  ;;  %v418_v3 = vld [vmem:[%s567_s1 + $0x70] sm:$0xff]   ;;  %v420_v5 = vld [vmem:[%s567_s1 + $0x68] sm:$0xff]   ;;  %410 = vmatprep.mubr.msk.bf16.mxu1 %vm443_vm0, %v442_v1 }
   0x2   :  { %v417_v2 = vld [vmem:[%s567_s1 + $0x38] sm:$0xff]   ;;  %363 = vmatprep.subr.bf16.mxu0 %v416_v0  ;;  %v419_v4 = vld [vmem:[%s567_s1 + $0x30] sm:$0xff]   ;;  %v421_v6 = vld [vmem:[%s567_s1 + $0x28] sm:$0xff]  }
   0x3   :  { %364 = vmatpush3.bf16.msra.mxu0 %v417_v2  ;;  %v422_v7 = vld [vmem:[%s567_s1 + $0x60] sm:$0xff]   ;;  %v424_v9 = vld [vmem:[%s567_s1 + $0x58] sm:$0xff]   ;;  %v426_v11 = vld [vmem:[%s567_s1 + $0x50] sm:$0xff]  }
   0x4   :  { %365 = vmatprep.subr.bf16.mxu0 %v418_v3  ;;  %v423_v8 = vld [vmem:[%s567_s1 + $0x20] sm:$0xff]   ;;  %v425_v10 = vld [vmem:[%s567_s1 + $0x18] sm:$0xff]   ;;  %v427_v15 = vld [vmem:[%s567_s1 + $0x10] sm:$0xff]  }
   0x5   :  { %v27_v12 = vld [vmem:[%s568_s0] sm:$0xff]  ;;  %v434_v14 = vld [vmem:[%s569_s3 + $0x38] sm:$0xff]   ;;  %v428_v16 = vld [vmem:[%s567_s1 + $0x48] sm:$0xff]  }
   0x6   :  { %v336_v13 = vcombine.high %v27_v12, %v27_v12  ;;  %395 = vmatpush3.bf16.msra.mxu1 %v434_v14  ;;  %v435_v17 = vld [vmem:[%s569_s3 + $0x30] sm:$0xff]   ;;  %v429_v18 = vld [vmem:[%s567_s1 + $0x8] sm:$0xff]   ;;  %v430_v19 = vld [vmem:[%s567_s1 + $0x40] sm:$0xff]   ;;  %v335_v23 = vcombine.low %v27_v12, %v27_v12 }
   0x7   :  { %366 = vmatpush3.bf16.msra.mxu0 %v419_v4  ;;  %396 = vmatprep.subr.bf16.mxu1 %v442_v1  ;;  %v436_v20 = vld [vmem:[%s569_s3 + $0x28] sm:$0xff]   ;;  %v431_v21 = vld [vmem:[%s567_s1] sm:$0xff]   ;;  %v438_v24 = vld [vmem:[%s569_s3 + $0x18] sm:$0xff]  }
   0x8   :  { %367 = vmatprep.subr.bf16.mxu0 %v420_v5  ;;  %195 = vmatprep.mubr.bf16.mxu0 %v336_v13  ;;  %v437_v22 = vld [vmem:[%s569_s3 + $0x20] sm:$0xff]   ;;  %v439_v25 = vld [vmem:[%s569_s3 + $0x10] sm:$0xff]   ;;  %v440_v26 = vld [vmem:[%s569_s3 + $0x8] sm:$0xff]  }
   0x9   :  { %v441_v27 = vld [vmem:[%s569_s3] sm:$0xff]  }
   0xa   :  { %397 = vmatpush3.bf16.msra.mxu1 %v435_v17  ;;  %v353_v30 = vld [vmem:[%s570_s2] ss:$0 sm:$0xff] }
   0xb   :  { %368 = vmatpush3.bf16.msra.mxu0 %v421_v6  ;;  %398 = vmatprep.subr.bf16.mxu1 %v442_v1  ;;  %v354_v36 = vld [vmem:[%s571_s4] ss:$0 sm:$0xff] }
   0xc   :  { %369 = vmatprep.subr.bf16.mxu0 %v422_v7 }
   0xe   :  { %399 = vmatpush3.bf16.msra.mxu1 %v436_v20 }
   0xf   :  { %370 = vmatpush3.bf16.msra.mxu0 %v423_v8  ;;  %400 = vmatprep.subr.bf16.mxu1 %v442_v1 }
  0x10   :  { %371 = vmatprep.subr.bf16.mxu0 %v424_v9 }
  0x12   :  { %401 = vmatpush3.bf16.msra.mxu1 %v437_v22 }
  0x13   :  { %372 = vmatpush3.bf16.msra.mxu0 %v425_v10  ;;  %402 = vmatprep.subr.bf16.mxu1 %v442_v1 }
  0x14   :  { %373 = vmatprep.subr.bf16.mxu0 %v426_v11 }
  0x16   :  { %403 = vmatpush3.bf16.msra.mxu1 %v438_v24 }
  0x17   :  { %374 = vmatpush3.bf16.msra.mxu0 %v427_v15  ;;  %404 = vmatprep.subr.bf16.mxu1 %v442_v1 }
  0x18   :  { %375 = vmatprep.subr.bf16.mxu0 %v428_v16 }
  0x1a   :  { %405 = vmatpush3.bf16.msra.mxu1 %v439_v25 }
  0x1b   :  { %376 = vmatpush3.bf16.msra.mxu0 %v429_v18  ;;  %406 = vmatprep.subr.bf16.mxu1 %v442_v1 }
  0x1c   :  { %377 = vmatprep.subr.bf16.mxu0 %v430_v19 }
  0x1e   :  { %407 = vmatpush3.bf16.msra.mxu1 %v440_v26 }
  0x1f   :  { %378 = vmatpush3.bf16.msra.mxu0 %v431_v21  ;;  %408 = vmatprep.subr.bf16.mxu1 %v442_v1 }
  0x22   :  { %196 = vmatmul.mubr.bf16.vlgmr.msra.gmra.mxu0 %v335_v23  ;;  %409 = vmatpush3.bf16.msra.mxu1 %v441_v27 }
  0xe2   :  { %v379_v28 = vpop.f32.mrf.mxu0 }
  0xe4   :  { %v380_v29 = vpop.f32.mrf.mxu0 }
  0xe5   :  { %v381_v31 = vadd.f32 %v380_v29, %v379_v28 }
  0xe6   :  { %v382_v32 = vpop.f32.mrf.mxu0 }
  0xe7   :  { %v216_v33 = vadd.f32 %v381_v31, %v353_v30 }
  0xe8   :  { %v383_v34 = vpop.f32.mrf.mxu0 }
  0xe9   :  { %v217_v35 = vpack.c.bf16 %v216_v33, %v216_v33 }
  0xeb   :  { %411 = vmatmul.mubr.bf16.vlgmr.msra.gmra.mxu1 %v217_v35 }
 0x1ab   :  { %v323_v37 = vpop.f32.mrf.mxu1 }
 0x1ac   :  { %v324_v38 = vadd.f32 %v354_v36, %v323_v37 }
 0x1ad   :  { %v412_v39 = vpop.f32.mrf.mxu1 }
 0x1ae   :  { %v329_v40 = vpack.c.bf16 %v324_v38, %v324_v38 }
 0x1af   :  { %v326_v41 = vpop.f32.mrf.mxu1 }
 0x1b0   :  { %330 = vst [vmem:[%s572_s5] sm:$0xf] %v329_v40 }
 0x1b1   :  { %v413_v42 = vpop.f32.mrf.mxu1 }

// kernel: siglip_wrapper_forward.3
= control target key start
LH: loop header
LB: loop body
LE: loop exit
PB: predicated region body
PF: predicated region fallthrough
CT: control target
= control target key end

     0   :  { %v260_v0 = vmov 0   ;;  %v261_v2 = vmov 0.0   ;;  %vm262_vm0 = vmmov 0   ;;  %v263_v12 = vmov 839922192   ;;  %s331_s1 = inlined_call_operand.vmem [shape: bf16[16,1], index: 1, kind: input, shape index: {}]   ;;  %s332_s2 = inlined_call_operand.vmem [shape: bf16[128,128], index: 2, kind: input, shape index: {}]   ;;  %s333_s0 = inlined_call_operand.vmem [shape: bf16[16,128], index: 0, kind: input, shape index: {}]   ;;  %s334_s3 = inlined_call_operand.vmem [shape: f32[1,128], index: 3, kind: input, shape index: {}]   ;;  %s335_s4 = inlined_call_operand.vmem [shape: bf16[16,128], index: 4, kind: output, shape index: {}]  }
   0x1   :  { %251 = vset.pattern.permute.xlu0 %v260_v0  ;;  %v26_v1 = vld [vmem:[%s331_s1] sm:$0xf]  ;;  %227 = vmatprep.subr.bf16.mxu0 %v261_v2  ;;  %v252_v3 = vld [vmem:[%s332_s2 + $0x38] sm:$0xff]   ;;  %v27_v4 = vld [vmem:[%s331_s1 + $0x4] sm:$0xf]  ;;  %v34_v13 = vunpack.c.l.s4 %v263_v12  ;;  %v36_v14 = vlaneseq }
   0x2   :  { %30 = vperm.xlu0 %251, %v26_v1   ;;  %228 = vmatpush3.bf16.msra.mxu0 %v252_v3  ;;  %v253_v5 = vld [vmem:[%s332_s2 + $0x30] sm:$0xff]   ;;  %v254_v6 = vld [vmem:[%s332_s2 + $0x28] sm:$0xff]   ;;  %v255_v7 = vld [vmem:[%s332_s2 + $0x20] sm:$0xff]  }
   0x3   :  { %229 = vmatprep.subr.bf16.mxu0 %v261_v2  ;;  %243 = vmatprep.mubr.msk.bf16.mxu0 %vm262_vm0, %v261_v2  ;;  %v256_v8 = vld [vmem:[%s332_s2 + $0x18] sm:$0xff]   ;;  %v257_v9 = vld [vmem:[%s332_s2 + $0x10] sm:$0xff]   ;;  %v258_v10 = vld [vmem:[%s332_s2 + $0x8] sm:$0xff]   ;;  %v35_v15 = vunpack.c.0.s8 %v34_v13  ;;  %v37_v16 = vshrl.u32 %v36_v14, 7 }
   0x4   :  { %v259_v11 = vld [vmem:[%s332_s2] sm:$0xff]  }
   0x5   :  { %v38_v17 = vsub.s32 %v35_v15, %v37_v16  ;;  %v24_v20 = vld [vmem:[%s333_s0] sm:$0xf]  ;;  %v25_v22 = vld [vmem:[%s333_s0 + $0x4] sm:$0xf] }
   0x6   :  { %42 = vperm.xlu0 %251, %v27_v4   ;;  %230 = vmatpush3.bf16.msra.mxu0 %v253_v5  ;;  %v208_v28 = vld [vmem:[%s334_s3] ss:$0 sm:$0xff] }
   0x7   :  { %231 = vmatprep.subr.bf16.mxu0 %v261_v2 }
   0xa   :  { %232 = vmatpush3.bf16.msra.mxu0 %v254_v6 }
   0xb   :  { %233 = vmatprep.subr.bf16.mxu0 %v261_v2 }
   0xe   :  { %234 = vmatpush3.bf16.msra.mxu0 %v255_v7 }
   0xf   :  { %235 = vmatprep.subr.bf16.mxu0 %v261_v2 }
  0x12   :  { %236 = vmatpush3.bf16.msra.mxu0 %v256_v8 }
  0x13   :  { %237 = vmatprep.subr.bf16.mxu0 %v261_v2 }
  0x16   :  { %238 = vmatpush3.bf16.msra.mxu0 %v257_v9 }
  0x17   :  { %239 = vmatprep.subr.bf16.mxu0 %v261_v2 }
  0x1a   :  { %240 = vmatpush3.bf16.msra.mxu0 %v258_v10 }
  0x1b   :  { %241 = vmatprep.subr.bf16.mxu0 %v261_v2 }
  0x1e   :  { %242 = vmatpush3.bf16.msra.mxu0 %v259_v11 }
  0x7d   :  { %v31_v18 = vpop.permute.xlu0 %30 }
  0x7e   :  { %v39_v19 = vrot.slane %v31_v18, %v38_v17 }
  0x80   :  { %v52_v24 = vmul.bf16 %v39_v19, %v24_v20 }
  0x81   :  { %v43_v21 = vpop.permute.xlu0 %42 }
  0x82   :  { %v51_v23 = vrot.slane %v43_v21, %v38_v17 }
  0x84   :  { %v53_v25 = vmul.bf16 %v51_v23, %v25_v22 }
  0x86   :  { %v199_v26 = vcombine.low %v52_v24, %v53_v25 }
  0x88   :  { %244 = vmatmul.mubr.bf16.vlgmr.msra.gmra.mxu0 %v199_v26 }
 0x148   :  { %v160_v27 = vpop.f32.mrf.mxu0 }
 0x149   :  { %v183_v31 = vadd.f32 %v208_v28, %v160_v27 }
 0x14a   :  { %v245_v29 = vpop.f32.mrf.mxu0 }
 0x14c   :  { %v163_v30 = vpop.f32.mrf.mxu0 }
 0x14d   :  { %v184_v32 = vadd.f32 %v208_v28, %v163_v30 }
 0x14e   :  { %v246_v33 = vpop.f32.mrf.mxu0 }
 0x14f   :  { %v216_v34 = vpack.c.bf16 %v184_v32, %v183_v31 }
 0x151   :  { %217 = vst [vmem:[%s335_s4] sm:$0xff] %v216_v34  }

</bundles_post_ra>
